<compile_context>
chip_gen: v7x
topology: tpu7x:2x2x1
jax: 0.10.0
libtpu: 0.0.40
codegen_flags: <defaults>
</compile_context>

<pallas_src>
import functools

import jax
import jax.numpy as jnp
from jax import lax
from jax.experimental import pallas as pl
from jax.experimental.pallas import tpu as pltpu

LANES = 128
MAX_TILE_ROWS = 1024  # (1024, 128) f32 block = 512 KiB per input buffer


def _round_up(a, b):
    return ((a + b - 1) // b) * b


def _js_div_partial_kernel(x_ref, y_ref, o_ref, *, tile_rows, n_rows, needs_mask):
    x = x_ref[...].astype(jnp.float32)
    y = y_ref[...].astype(jnp.float32)

    cond_y = y > 0
    cond_x = x > 0
    if needs_mask:
        # Mask rows of the (possibly) overhanging last block (garbage data).
        row_in_blk = lax.broadcasted_iota(jnp.int32, (tile_rows, LANES), 0)
        row_global = row_in_blk + pl.program_id(0) * tile_rows
        valid = row_global < n_rows
        cond_y = jnp.logical_and(cond_y, valid)
        cond_x = jnp.logical_and(cond_x, valid)

    safe_y = jnp.where(cond_y, y, 1.0)
    safe_x = jnp.where(cond_x, x, 1.0)
    xy = x * y
    # KLDivLoss pointwise: target * (log(target) - input), zero where target <= 0.
    t1 = jnp.where(cond_y, y * jnp.log(safe_y) - xy, 0.0)  # engine(x, y) terms
    t2 = jnp.where(cond_x, x * jnp.log(safe_x) - xy, 0.0)  # engine(y, x) terms
    t = t1 + t2

    # Fold (tile_rows, 128) -> (8, 128) with pure VPU vreg adds; the single
    # expensive cross-lane/sublane reduction happens once in the wrapper over
    # the tiny partials array.
    part = jnp.sum(t.reshape(tile_rows // 8, 8, LANES), axis=0)
    o_ref[0] = part


@jax.jit
def js_divergence(x, y):
    assert x.shape == y.shape, "x and y must have the same shape"
    n_elems = x.size

    x_flat = jnp.ravel(x)
    y_flat = jnp.ravel(y)

    # Rows of 128 lanes; keep at least one full (8, 128) tile so block <= array.
    n_rows = max(pl.cdiv(n_elems, LANES), 8)
    padded_len = n_rows * LANES
    pad = padded_len - n_elems
    if pad > 0:
        # Zero padding contributes 0 to both masked KL terms.
        x_flat = jnp.pad(x_flat, (0, pad))
        y_flat = jnp.pad(y_flat, (0, pad))

    x2 = x_flat.reshape(n_rows, LANES)
    y2 = y_flat.reshape(n_rows, LANES)

    # Tile: multiple of 8 sublanes, never larger than the array's row count.
    tile_rows = min(MAX_TILE_ROWS, (n_rows // 8) * 8)
    num_blocks = pl.cdiv(n_rows, tile_rows)
    needs_mask = (n_rows % tile_rows) != 0

    kernel = functools.partial(
        _js_div_partial_kernel,
        tile_rows=tile_rows,
        n_rows=n_rows,
        needs_mask=needs_mask,
    )

    partials = pl.pallas_call(
        kernel,
        out_shape=jax.ShapeDtypeStruct((num_blocks, 8, LANES), jnp.float32),
        grid_spec=pltpu.PrefetchScalarGridSpec(
            num_scalar_prefetch=0,
            grid=(num_blocks,),
            in_specs=[
                pl.BlockSpec((tile_rows, LANES), lambda i: (i, 0)),
                pl.BlockSpec((tile_rows, LANES), lambda i: (i, 0)),
            ],
            out_specs=pl.BlockSpec((1, 8, LANES), lambda i: (i, 0, 0)),
        ),
        compiler_params=pltpu.CompilerParams(
            dimension_semantics=("parallel",),  # no carried state -> megacore ok
            vmem_limit_bytes=32 * 1024 * 1024,
        ),
    )(x2, y2)

    # reduction='mean' over all elements for both KL terms (same element count).
    return jnp.sum(partials) / jnp.float32(n_elems)


def _reference_js_divergence(x, y):
    # Pure-JAX reference mirroring torch.nn.KLDivLoss(reduction='mean').
    x = x.astype(jnp.float32)
    y = y.astype(jnp.float32)
    t1 = jnp.where(y > 0, y * (jnp.log(jnp.where(y > 0, y, 1.0)) - x), 0.0)
    t2 = jnp.where(x > 0, x * (jnp.log(jnp.where(x > 0, x, 1.0)) - y), 0.0)
    return jnp.mean(t1) + jnp.mean(t2)


if __name__ == "__main__":
    key = jax.random.PRNGKey(0)
    kx, ky = jax.random.split(key)

    # NCHW-style example inputs: x ~ log-probabilities, y ~ probabilities.
    shape = (2, 4, 16, 16)
    x = jax.nn.log_softmax(jax.random.normal(kx, shape), axis=1)
    y = jax.nn.softmax(jax.random.normal(ky, shape), axis=1)

    out = jax.block_until_ready(js_divergence(x, y))
    ref = _reference_js_divergence(x, y)
    assert jnp.allclose(out, ref, atol=1e-5, rtol=1e-5), (out, ref)

    # Ragged-size input (exercises the pad-to-lane-multiple path).
    shape2 = (3, 5, 7)
    x2 = jax.nn.log_softmax(jax.random.normal(kx, shape2), axis=0)
    y2 = jax.nn.softmax(jax.random.normal(ky, shape2), axis=0)
    out2 = jax.block_until_ready(js_divergence(x2, y2))
    ref2 = _reference_js_divergence(x2, y2)
    assert jnp.allclose(out2, ref2, atol=1e-5, rtol=1e-5), (out2, ref2)

    print("KERNEL_OK")
</pallas_src>

<mosaic_0001>
module attributes {stable_mosaic.version = 11 : i64} {
  func.func @_js_div_partial_kernel(%arg0: i32, %arg1: memref<16x128xf32, #tpu.memory_space<vmem>>, %arg2: memref<16x128xf32, #tpu.memory_space<vmem>>, %arg3: memref<1x8x128xf32, #tpu.memory_space<vmem>>) attributes {dimension_semantics = [#tpu.dimension_semantics<parallel>], iteration_bounds = array<i64: 1>, scalar_prefetch = 0 : i64, scratch_operands = 0 : i64, tpu.core_type = #tpu.core_type<tc>, window_params = [{transform_indices = @transform_0, window_bounds = array<i64: 16, 128>}, {transform_indices = @transform_1, window_bounds = array<i64: 16, 128>}, {transform_indices = @transform_2, window_bounds = array<i64: 1, 8, 128>}]} {
    %c0 = arith.constant 0 : index
    %c0_0 = arith.constant 0 : index
    %0 = vector.load %arg1[%c0, %c0_0] : memref<16x128xf32, #tpu.memory_space<vmem>>, vector<16x128xf32>
    %c0_1 = arith.constant 0 : index
    %c0_2 = arith.constant 0 : index
    %1 = vector.load %arg2[%c0_1, %c0_2] : memref<16x128xf32, #tpu.memory_space<vmem>>, vector<16x128xf32>
    %cst = arith.constant 0.000000e+00 : f32
    %2 = vector.broadcast %cst : f32 to vector<16x128xf32>
    %3 = arith.cmpf ogt, %1, %2 : vector<16x128xf32>
    %cst_3 = arith.constant 0.000000e+00 : f32
    %4 = vector.broadcast %cst_3 : f32 to vector<16x128xf32>
    %5 = arith.cmpf ogt, %0, %4 : vector<16x128xf32>
    %cst_4 = arith.constant 1.000000e+00 : f32
    %6 = vector.broadcast %cst_4 : f32 to vector<16x128xf32>
    %7 = arith.select %3, %1, %6 : vector<16x128xi1>, vector<16x128xf32>
    %cst_5 = arith.constant 1.000000e+00 : f32
    %8 = vector.broadcast %cst_5 : f32 to vector<16x128xf32>
    %9 = arith.select %5, %0, %8 : vector<16x128xi1>, vector<16x128xf32>
    %10 = arith.mulf %0, %1 : vector<16x128xf32>
    %11 = math.log %7 : vector<16x128xf32>
    %12 = arith.mulf %1, %11 : vector<16x128xf32>
    %13 = arith.subf %12, %10 : vector<16x128xf32>
    %cst_6 = arith.constant 0.000000e+00 : f32
    %14 = vector.broadcast %cst_6 : f32 to vector<16x128xf32>
    %15 = arith.select %3, %13, %14 : vector<16x128xi1>, vector<16x128xf32>
    %16 = math.log %9 : vector<16x128xf32>
    %17 = arith.mulf %0, %16 : vector<16x128xf32>
    %18 = arith.subf %17, %10 : vector<16x128xf32>
    %cst_7 = arith.constant 0.000000e+00 : f32
    %19 = vector.broadcast %cst_7 : f32 to vector<16x128xf32>
    %20 = arith.select %5, %18, %19 : vector<16x128xi1>, vector<16x128xf32>
    %21 = arith.addf %15, %20 : vector<16x128xf32>
    %22 = vector.shape_cast %21 : vector<16x128xf32> to vector<2x8x128xf32>
    %cst_8 = arith.constant dense<0.000000e+00> : vector<8x128xf32>
    %23 = vector.multi_reduction <add>, %22, %cst_8 [0] : vector<2x8x128xf32> to vector<8x128xf32>
    %c0_9 = arith.constant 0 : index
    %c0_10 = arith.constant 0 : index
    %c0_11 = arith.constant 0 : index
    %24 = vector.load %arg3[%c0_9, %c0_10, %c0_11] : memref<1x8x128xf32, #tpu.memory_space<vmem>>, vector<1x8x128xf32>
    %25 = vector.shape_cast %24 : vector<1x8x128xf32> to vector<8x128xf32>
    %26 = vector.shape_cast %23 : vector<8x128xf32> to vector<1x8x128xf32>
    tpu.vector_store %arg3[%c0_9, %c0_10, %c0_11], %26 {strides = array<i32>} : memref<1x8x128xf32, #tpu.memory_space<vmem>>, vector<1x8x128xf32>,
    return
  }
  func.func @transform_0(%arg0: i32) -> (i32, i32) {
    %c0_i32 = arith.constant 0 : i32
    %c0_i32_0 = arith.constant 0 : i32
    return %arg0, %c0_i32 : i32, i32
  }
  func.func @transform_1(%arg0: i32) -> (i32, i32) {
    %c0_i32 = arith.constant 0 : i32
    %c0_i32_0 = arith.constant 0 : i32
    return %arg0, %c0_i32 : i32, i32
  }
  func.func @transform_2(%arg0: i32) -> (i32, i32, i32) {
    %c0_i32 = arith.constant 0 : i32
    %c0_i32_0 = arith.constant 0 : i32
    %c0_i32_1 = arith.constant 0 : i32
    return %arg0, %c0_i32, %c0_i32_0 : i32, i32, i32
  }
}

</mosaic_0001>

<bundles_post_ra>
// kernel: js_divergence.1
= control target key start
LH: loop header
LB: loop body
LE: loop exit
PB: predicated region body
PF: predicated region fallthrough
CT: control target
= control target key end

     0   :  { %s99_s0 = inlined_call_operand.vmem [shape: f32[16,128], index: 0, kind: input, shape index: {}]   ;;  %s100_s1 = inlined_call_operand.vmem [shape: f32[16,128], index: 1, kind: input, shape index: {}]   ;;  %s101_s2 = inlined_call_operand.vmem [shape: f32[1,8,128], index: 2, kind: output, shape index: {}]  }
   0x1   :  { %v11_v0 = vld [vmem:[%s99_s0] sm:$0xff]  ;;  %v12_v1 = vld [vmem:[%s99_s0 + $0x8] sm:$0xff] }
   0x2   :  { %v13_v2 = vld [vmem:[%s100_s1] sm:$0xff]  ;;  %v14_v3 = vld [vmem:[%s100_s1 + $0x8] sm:$0xff]  ;;  %vm17_vm1 = vcmp.gt.f32.partialorder %v11_v0, 0.0  ;;  %vm18_vm2 = vcmp.gt.f32.partialorder %v12_v1, 0.0 }
   0x3   :  { %vm15_vm0 = vcmp.gt.f32.partialorder %v13_v2, 0.0  ;;  %vm16_vm3 = vcmp.gt.f32.partialorder %v14_v3, 0.0  ;;  %v21_v5 = vsel %vm17_vm1, %v11_v0, 1.0  ;;  %v22_v7 = vsel %vm18_vm2, %v12_v1, 1.0 }
   0x4   :  { %v19_v4 = vsel %vm15_vm0, %v13_v2, 1.0  ;;  %v20_v6 = vsel %vm16_vm3, %v14_v3, 1.0  ;;  %v23_v10 = vmul.f32 %v13_v2, %v11_v0  ;;  %v24_v13 = vmul.f32 %v14_v3, %v12_v1 }
   0x5   :  { %53 = vlog2.f32 %v19_v4 }
   0x6   :  { %55 = vlog2.f32 %v20_v6 }
   0x7   :  { %57 = vlog2.f32 %v21_v5 }
   0x8   :  { %59 = vlog2.f32 %v22_v7 }
   0xf   :  { %v54_v8 = vpop.eup %53 }
  0x10   :  { %v56_v9 = vpop.eup %55  ;;  %v26_v11 = vmul.f32 0.6931472, %v54_v8 }
  0x11   :  { %v58_v12 = vpop.eup %57  ;;  %v28_v14 = vmul.f32 0.6931472, %v56_v9 }
  0x12   :  { %v60_v15 = vpop.eup %59  ;;  %v29_v16 = vmul.f32 %v26_v11, %v13_v2  ;;  %v36_v17 = vmul.f32 0.6931472, %v58_v12 }
  0x13   :  { %v30_v18 = vmul.f32 %v28_v14, %v14_v3  ;;  %v38_v19 = vmul.f32 0.6931472, %v60_v15 }
  0x14   :  { %v31_v20 = vsub.f32 %v29_v16, %v23_v10  ;;  %v39_v21 = vmul.f32 %v36_v17, %v11_v0 }
  0x15   :  { %v32_v22 = vsub.f32 %v30_v18, %v24_v13  ;;  %v40_v23 = vmul.f32 %v38_v19, %v12_v1 }
  0x16   :  { %v33_v24 = vsel %vm15_vm0, %v31_v20, 0.0  ;;  %v41_v25 = vsub.f32 %v39_v21, %v23_v10 }
  0x17   :  { %v34_v26 = vsel %vm16_vm3, %v32_v22, 0.0  ;;  %v42_v27 = vsub.f32 %v40_v23, %v24_v13 }
  0x18   :  { %v43_v28 = vsel %vm17_vm1, %v41_v25, 0.0 }
  0x19   :  { %v44_v29 = vsel %vm18_vm2, %v42_v27, 0.0  ;;  %v45_v30 = vadd.f32 %v43_v28, %v33_v24 }
  0x1a   :  { %v46_v31 = vadd.f32 %v44_v29, %v34_v26 }
  0x1c   :  { %v47_v32 = vadd.f32 %v46_v31, %v45_v30 }
  0x1e   :  { %48 = vst [vmem:[%s101_s2] sm:$0xff] %v47_v32 }

</bundles_post_ra>
